<compile_context>
chip_gen: v7x
topology: tpu7x:2x2x1
jax: 0.10.0
libtpu: 0.0.40
codegen_flags: <defaults>
</compile_context>

<pallas_src>
import numpy as np
import jax
import jax.numpy as jnp
from jax.experimental import pallas as pl
from jax.experimental.pallas import tpu as pltpu

A = -0.75            # PyTorch bicubic convolution coefficient
_MIB = 1024 * 1024


def _cubic_w1(x):
    # |x| <= 1 branch of the Keys cubic kernel
    return ((A + 2.0) * x - (A + 3.0)) * x * x + 1.0


def _cubic_w2(x):
    # 1 < |x| < 2 branch of the Keys cubic kernel
    return ((A * x - 5.0 * A) * x + 8.0 * A) * x - 4.0 * A


def bicubic_downsample_matrix_np(in_size, out_size, coord_scale):
    """Dense (out_size, in_size) float32 matrix reproducing PyTorch bicubic
    interpolate (align_corners=False, border-clamped taps, no antialias).

    coord_scale is the source-coordinate stride; PyTorch uses 1/scale_factor
    when scale_factor is given (== in_size/out_size for even sizes)."""
    D = np.zeros((out_size, in_size), dtype=np.float32)
    for i in range(out_size):
        src = (i + 0.5) * coord_scale - 0.5          # align_corners=False
        fi = int(np.floor(src))
        t = src - fi
        w = [_cubic_w2(t + 1.0), _cubic_w1(t), _cubic_w1(1.0 - t), _cubic_w2(2.0 - t)]
        for k in range(4):
            idx = min(max(fi - 1 + k, 0), in_size - 1)   # clamp at borders
            D[i, idx] += w[k]
    return D


def _round_up(x, m):
    return ((x + m - 1) // m) * m


def _vmem_limit(block_bytes):
    # Block buffers + headroom for compiler scratch.  Floor 32 MiB (>= every
    # generation's scoped default we need), cap 100 MiB (v5e/v6e physical is
    # 128 MiB; normal workloads stay <= ~48 MiB, under v7x's 64 MiB physical).
    return int(min(max(block_bytes + 8 * _MIB, 32 * _MIB), 100 * _MIB))


# ---------------------------------------------------------------------------
# Kernels
# ---------------------------------------------------------------------------

def sr_kron_kernel(x_ref, kt_ref, o_ref):
    # x_ref: (Bc, H*W)   kt_ref: (H*W, No_pad)   o_ref: (Bc, No_pad)
    o_ref[...] = jnp.dot(
        x_ref[...], kt_ref[...], preferred_element_type=jnp.float32
    ).astype(o_ref.dtype)


def make_sep_kernel(merge_w_gemm):
    def sr_sep_kernel(x_ref, dwt_ref, dh_ref, o_ref, tmp_ref):
        # x_ref: (Bc, H, W)  dwt_ref: (W, Wo)  dh_ref: (Ho, H)
        # o_ref: (Bc, Ho, Wo)  tmp_ref: (Bc, H, Wo) f32 VMEM scratch
        bc, h, w = x_ref.shape
        wo = dwt_ref.shape[1]
        if merge_w_gemm:
            # One big lane-contraction GEMM: (Bc*H, W) @ (W, Wo), M = Bc*H.
            x2 = x_ref[...].reshape(bc * h, w)
            tmp_ref[...] = jnp.dot(
                x2, dwt_ref[...], preferred_element_type=jnp.float32
            ).reshape(bc, h, wo)
        else:
            def w_body(b, c):
                tmp_ref[b] = jnp.dot(x_ref[b], dwt_ref[...],
                                     preferred_element_type=jnp.float32)
                return c
            jax.lax.fori_loop(0, bc, w_body, 0)

        def h_body(b, c):
            o_ref[b] = jnp.dot(dh_ref[...], tmp_ref[b],
                               preferred_element_type=jnp.float32).astype(o_ref.dtype)
            return c
        jax.lax.fori_loop(0, bc, h_body, 0)
        # TODO(synk): exploit the fixed 4-tap / stride-2 band structure of
        # Dh/Dw (shifted VPU FMAs) and/or fuse the H contraction into one
        # (Ho, H) @ (H, Bc*Wo) lane-dense GEMM so huge images stay HBM-bound.
    return sr_sep_kernel


# ---------------------------------------------------------------------------
# Wrapper
# ---------------------------------------------------------------------------

_KRON_MAX_HW = 1024            # roofline crossover: beyond this the fused kron
                               # GEMM burns f32 MXU flops on >95%-zero weights.
_KRON_VMEM_BUDGET = 16 * _MIB
_SEP_VMEM_BUDGET = 40 * _MIB


def _sr_kron(xf, Dh_np, Dw_np, N, C, H, W, Ho, Wo):
    NC = N * C
    HW = H * W
    No = Ho * Wo
    No_pad = _round_up(No, 128)        # lane-dense output block -> unmasked vst

    KT_np = np.zeros((HW, No_pad), dtype=np.float32)
    KT_np[:, :No] = np.kron(Dh_np, Dw_np).T
    KT = jnp.asarray(KT_np)
    x2 = xf.reshape(NC, HW)

    # ---- VMEM-budgeted batch block (explicit double-buffer accounting) ----
    # TODO(synk): pipeline_mode=pl.Buffered(1) on the grid-constant KT block
    # would halve its footprint; with HW <= 1024 it is <= 1 MiB so we simply
    # account for 2x here.
    kt_bytes = 2 * HW * No_pad * 4
    per_row = 2 * (HW + No_pad) * 4          # double-buffered x row + out row
    bc = max(8, ((_KRON_VMEM_BUDGET - kt_bytes) // per_row) // 8 * 8)
    bc = min(bc, 512)
    if NC >= 16:
        # >= 2 grid steps so the "parallel" batch axis shards over v7x's 2 TCs.
        bc = min(bc, _round_up(pl.cdiv(NC, 2), 8))
    if bc >= NC:
        bc = NC
    grid = (pl.cdiv(NC, bc),)
    block_bytes = kt_bytes + bc * per_row

    out = pl.pallas_call(
        sr_kron_kernel,
        out_shape=jax.ShapeDtypeStruct((NC, No_pad), jnp.float32),
        grid_spec=pltpu.PrefetchScalarGridSpec(
            num_scalar_prefetch=0,
            grid=grid,
            in_specs=[
                pl.BlockSpec((bc, HW), lambda i: (i, 0)),
                pl.BlockSpec((HW, No_pad), lambda i: (0, 0)),
            ],
            out_specs=pl.BlockSpec((bc, No_pad), lambda i: (i, 0)),
        ),
        compiler_params=pltpu.CompilerParams(
            dimension_semantics=("parallel",),
            vmem_limit_bytes=_vmem_limit(block_bytes)),
        cost_estimate=pl.CostEstimate(
            flops=int(2.0 * NC * HW * No_pad), transcendentals=0,
            bytes_accessed=int((NC * HW + HW * No_pad + NC * No_pad) * 4)),
    )(x2, KT)
    return out[:, :No].reshape(N, C, Ho, Wo)


def _sr_separable(xf, Dh_np, Dw_np, N, C, H, W, Ho, Wo):
    NC = N * C
    Dh = jnp.asarray(Dh_np)            # (Ho, H)
    DwT = jnp.asarray(Dw_np.T)         # (W, Wo) -- transpose hoisted to host

    # ---- VMEM-budgeted batch block (explicit double-buffer accounting) ----
    const_bytes = 2 * (Ho * H + W * Wo) * 4            # Dh + DwT (2x buffered)
    per_img = (2 * H * W + 2 * Ho * Wo + H * Wo) * 4   # 2x x-blk, 2x out-blk, tmp
    bc = max(1, (_SEP_VMEM_BUDGET - const_bytes) // per_img)
    bc = min(bc, 256, NC)
    if NC >= 2:
        bc = min(bc, -(-NC // 2))      # >= 2 grid steps for v7x's 2 TCs
    grid = (pl.cdiv(NC, bc),)
    block_bytes = const_bytes + bc * per_img
    # TODO(synk): for images where even a single (1, H, W) block exceeds VMEM,
    # add a grid axis over Ho row-tiles with a 4-tap halo window on the input.

    out = pl.pallas_call(
        make_sep_kernel(merge_w_gemm=(H % 8 == 0)),
        out_shape=jax.ShapeDtypeStruct((NC, Ho, Wo), jnp.float32),
        grid_spec=pltpu.PrefetchScalarGridSpec(
            num_scalar_prefetch=0,
            grid=grid,
            in_specs=[
                pl.BlockSpec((bc, H, W), lambda i: (i, 0, 0)),
                pl.BlockSpec((W, Wo), lambda i: (0, 0)),
                pl.BlockSpec((Ho, H), lambda i: (0, 0)),
            ],
            out_specs=pl.BlockSpec((bc, Ho, Wo), lambda i: (i, 0, 0)),
            scratch_shapes=[pltpu.VMEM((bc, H, Wo), jnp.float32)],
        ),
        compiler_params=pltpu.CompilerParams(
            dimension_semantics=("parallel",),
            vmem_limit_bytes=_vmem_limit(block_bytes)),
        cost_estimate=pl.CostEstimate(
            flops=int(2.0 * NC * (H * W * Wo + Ho * H * Wo)),
            transcendentals=0,
            bytes_accessed=int((NC * H * W + Ho * H + W * Wo + NC * Ho * Wo) * 4)),
    )(xf, DwT, Dh)
    return out.reshape(N, C, Ho, Wo)


def sr_forward(x, scale_factor=2):
    """SR.forward: bicubic 1/scale_factor downsample, float32 output (NCHW)."""
    N, C, H, W = x.shape
    Ho, Wo = H // scale_factor, W // scale_factor
    NC = N * C
    # PyTorch uses scale = 1/scale_factor (= scale_factor here) for the source
    # coordinate mapping, not in_size/out_size (differs when H or W is odd).
    coord = float(scale_factor)
    xf = x.reshape(NC, H, W).astype(jnp.float32)

    Dh_np = bicubic_downsample_matrix_np(H, Ho, coord)   # (Ho, H)
    Dw_np = bicubic_downsample_matrix_np(W, Wo, coord)   # (Wo, W)

    if H * W <= _KRON_MAX_HW:
        return _sr_kron(xf, Dh_np, Dw_np, N, C, H, W, Ho, Wo)
    return _sr_separable(xf, Dh_np, Dw_np, N, C, H, W, Ho, Wo)


if __name__ == "__main__":
    key = jax.random.PRNGKey(0)
    x = jax.random.normal(key, (2, 4, 16, 16), dtype=jnp.float32)

    y = sr_forward(x, scale_factor=2)
    y = jax.block_until_ready(y)

    # Plain-JAX reference of the same separable bicubic downsample.
    Dh = jnp.asarray(bicubic_downsample_matrix_np(16, 8, 2.0))
    Dw = jnp.asarray(bicubic_downsample_matrix_np(16, 8, 2.0))
    y_ref = jnp.einsum("oh,nchw,pw->ncop", Dh, x, Dw)

    assert y.shape == (2, 4, 8, 8)
    assert y.dtype == jnp.float32
    assert jnp.allclose(y, y_ref, atol=1e-4, rtol=1e-4)

    print("KERNEL_OK")
</pallas_src>

<mosaic_0001>
module attributes {stable_mosaic.version = 11 : i64} {
  func.func @sr_kron_kernel(%arg0: i32, %arg1: memref<8x256xf32, #tpu.memory_space<vmem>>, %arg2: memref<256x128xf32, #tpu.memory_space<vmem>>, %arg3: memref<8x128xf32, #tpu.memory_space<vmem>>) attributes {dimension_semantics = [#tpu.dimension_semantics<parallel>], iteration_bounds = array<i64: 1>, scalar_prefetch = 0 : i64, scratch_operands = 0 : i64, tpu.core_type = #tpu.core_type<tc>, window_params = [{transform_indices = @transform_0, window_bounds = array<i64: 8, 256>}, {pipeline_mode = #tpu.pipeline_mode<synchronous>, transform_indices = @transform_1, window_bounds = array<i64: 256, 128>}, {transform_indices = @transform_2, window_bounds = array<i64: 8, 128>}]} {
    %c0 = arith.constant 0 : index
    %c0_0 = arith.constant 0 : index
    %0 = vector.load %arg1[%c0, %c0_0] : memref<8x256xf32, #tpu.memory_space<vmem>>, vector<8x256xf32>
    %c0_1 = arith.constant 0 : index
    %c0_2 = arith.constant 0 : index
    %1 = vector.load %arg2[%c0_1, %c0_2] : memref<256x128xf32, #tpu.memory_space<vmem>>, vector<256x128xf32>
    %cst = arith.constant dense<0.000000e+00> : vector<8x128xf32>
    %2 = tpu.matmul %0, %1, %cst {dimension_numbers = #tpu.dot_dimension_numbers<[1], [0], [0], [1], [0, 0, 1, 1], [], []>} : vector<8x256xf32>, vector<256x128xf32>, vector<8x128xf32> -> vector<8x128xf32>
    %c0_3 = arith.constant 0 : index
    %c0_4 = arith.constant 0 : index
    %3 = vector.load %arg3[%c0_3, %c0_4] : memref<8x128xf32, #tpu.memory_space<vmem>>, vector<8x128xf32>
    tpu.vector_store %arg3[%c0_3, %c0_4], %2 {strides = array<i32>} : memref<8x128xf32, #tpu.memory_space<vmem>>, vector<8x128xf32>,
    return
  }
  func.func @transform_0(%arg0: i32) -> (i32, i32) {
    %c0_i32 = arith.constant 0 : i32
    %c0_i32_0 = arith.constant 0 : i32
    return %arg0, %c0_i32 : i32, i32
  }
  func.func @transform_1(%arg0: i32) -> (i32, i32) {
    %c0_i32 = arith.constant 0 : i32
    %c0_i32_0 = arith.constant 0 : i32
    %c0_i32_1 = arith.constant 0 : i32
    return %c0_i32, %c0_i32_0 : i32, i32
  }
  func.func @transform_2(%arg0: i32) -> (i32, i32) {
    %c0_i32 = arith.constant 0 : i32
    %c0_i32_0 = arith.constant 0 : i32
    return %arg0, %c0_i32 : i32, i32
  }
}

</mosaic_0001>

<bundles_post_ra>
// kernel: tpu_custom_call.1
= control target key start
LH: loop header
LB: loop body
LE: loop exit
PB: predicated region body
PF: predicated region fallthrough
CT: control target
= control target key end

     0   :  { %7 = vsyncpa [#allocation3], 0  ;;  %s366_s0 = inlined_call_operand.hbm [shape: f32[8,256], index: 0, kind: input, shape index: {}]   ;;  %s367_s1 = inlined_call_operand.hbm [shape: f32[256,128], index: 1, kind: input, shape index: {}]   ;;  %s368_s2 = inlined_call_operand.hbm [shape: f32[8,128], index: 2, kind: output, shape index: {}]  }
   0x1   :  { %8 = vsyncpa [#allocation6], 0 }
   0x2   :  { %9 = vsyncpa [#allocation4], 0  ;;  %s303_s9 = smov [#allocation2]   ;;  %s304_s11 = smov [#allocation5]  }
   0x3   :  { %s16_s10 = sshll.u32 %s303_s9, 4  ;;  %s25_s12 = sshll.u32 %s304_s11, 4  ;;  %s17_s10 = int_to_ptr.vmem [resolvable:$true] %s16_s10  ;;  %s323_s12 = int_to_ptr.vmem [resolvable:$true] %s25_s12 }
   0x4   :  { %s231_s15 = scalar_lea.hbm %s366_s0, 256 }
   0x5   :  { %p232_p0 = scmp.ne.s32.totalorder %s366_s0, %s231_s15  ;;  %p235_p1 = scmp.lt.u32.totalorder %s231_s15, %s366_s0 }
   0x7   :  { %p237_p2 = pnand %p235_p1, %p232_p0 }
   0x9   :  { %240 = shalt.err (!%p237_p2)
}
   0xa   :  { %s241_s20 = scalar_lea.vmem %s17_s10, 256  ;;  %p246_p4 = scmp.lt.s32.totalorder %s17_s10, %s17_s10 }
   0xb   :  { %p242_p3 = scmp.ne.s32.totalorder %s17_s10, %s241_s20  ;;  %p247_p5 = scmp.lt.s32.totalorder %s241_s20, %s241_s20 }
   0xd   :  { %p248_p6 = por %p247_p5, %p246_p4 }
   0xf   :  { %p249_p7 = pnand %p248_p6, %p242_p3 }
  0x11   :  { %252 = shalt.err (!%p249_p7)
}
  0x12   :  { %19 = dma.hbm_to_vmem [thread:$0]  %s366_s0, 256, %s17_s10, [#allocation3]  }
  0x13   :  { %s253_s25 = scalar_lea.hbm %s367_s1, 4096 }
  0x14   :  { %p254_p8 = scmp.ne.s32.totalorder %s367_s1, %s253_s25  ;;  %p257_p9 = scmp.lt.u32.totalorder %s253_s25, %s367_s1 }
  0x16   :  { %p259_p10 = pnand %p257_p9, %p254_p8 }
  0x18   :  { %262 = shalt.err (!%p259_p10)
}
  0x19   :  { %s263_s30 = scalar_lea.vmem %s323_s12, 4096  ;;  %p268_p12 = scmp.lt.s32.totalorder %s323_s12, %s323_s12 }
  0x1a   :  { %p264_p11 = scmp.ne.s32.totalorder %s323_s12, %s263_s30  ;;  %p269_p13 = scmp.lt.s32.totalorder %s263_s30, %s263_s30 }
  0x1c   :  { %p270_p0 = por %p269_p13, %p268_p12 }
  0x1e   :  { %p271_p1 = pnand %p270_p0, %p264_p11 }
  0x20   :  { %274 = shalt.err (!%p271_p1)
}
  0x21   :  { %s305_s0 = smov 128   ;;  %s306_s3 = smov 8  }
  0x22   :  { %31 = dma.hbm_to_vmem [thread:$0]  %s367_s1, 4096, %s323_s12, [#allocation6], %s305_s0, %s305_s0, %s306_s3  }
  0x23   :  { %297 = dma.done.wait [#allocation3], 256  }
  0x24   :  { %298 = vsyncadd [#allocation3], 4294967040 }
  0x25   :  { %299 = dma.done.wait [#allocation6], 4096  }
  0x26   :  { %300 = vsyncadd [#allocation6], 4294963200  ;;  %v56_v0 = vld [vmem:[#allocation5 + $0x80] sm:$0xff]  ;;  %v57_v1 = vld [vmem:[#allocation5 + $0x88] sm:$0xff]  ;;  %s307_s1 = smov [#allocation7]  }
  0x27   :  { %v40_v2 = vld [vmem:[#allocation5] sm:$0xff]  ;;  %v194_v3 = vpack.c.bf16 %v57_v1, %v56_v0  ;;  %v41_v4 = vld [vmem:[#allocation5 + $0x8] sm:$0xff]  ;;  %v58_v5 = vld [vmem:[#allocation5 + $0x90] sm:$0xff]  ;;  %s149_s6 = sshll.u32 %s307_s1, 4  ;;  %s150_s6 = int_to_ptr.vmem [resolvable:$true] %s149_s6 }
  0x28   :  { %v59_v6 = vld [vmem:[#allocation5 + $0x98] sm:$0xff]  ;;  %v196_v7 = vpack.c.bf16 %v41_v4, %v40_v2  ;;  %v42_v9 = vld [vmem:[#allocation5 + $0x10] sm:$0xff]  ;;  %v60_v11 = vld [vmem:[#allocation5 + $0xa0] sm:$0xff]  ;;  %s275_s7 = scalar_lea.vmem %s150_s6, 128  ;;  %p280_p3 = scmp.lt.s32.totalorder %s150_s6, %s150_s6 }
  0x29   :  { %v198_v8 = vpack.c.bf16 %v59_v6, %v58_v5  ;;  %v43_v10 = vld [vmem:[#allocation5 + $0x18] sm:$0xff]  ;;  %195 = vmatprep.subr.bf16.mxu0 %v194_v3  ;;  %v61_v12 = vld [vmem:[#allocation5 + $0xa8] sm:$0xff]  ;;  %v44_v15 = vld [vmem:[#allocation5 + $0x20] sm:$0xff]  ;;  %p276_p2 = scmp.ne.s32.totalorder %s150_s6, %s275_s7  ;;  %p281_p4 = scmp.lt.s32.totalorder %s275_s7, %s275_s7 }
  0x2a   :  { %197 = vmatpush3.bf16.msra.mxu0 %v196_v7  ;;  %v200_v13 = vpack.c.bf16 %v43_v10, %v42_v9  ;;  %v202_v14 = vpack.c.bf16 %v61_v12, %v60_v11  ;;  %v45_v16 = vld [vmem:[#allocation5 + $0x28] sm:$0xff]  ;;  %v62_v17 = vld [vmem:[#allocation5 + $0xb0] sm:$0xff]  ;;  %v63_v18 = vld [vmem:[#allocation5 + $0xb8] sm:$0xff] }
  0x2b   :  { %199 = vmatprep.subr.bf16.mxu0 %v198_v8  ;;  %v204_v19 = vpack.c.bf16 %v45_v16, %v44_v15  ;;  %v206_v20 = vpack.c.bf16 %v63_v18, %v62_v17  ;;  %v46_v21 = vld [vmem:[#allocation5 + $0x30] sm:$0xff]  ;;  %v47_v22 = vld [vmem:[#allocation5 + $0x38] sm:$0xff]  ;;  %v64_v23 = vld [vmem:[#allocation5 + $0xc0] sm:$0xff]  ;;  %p282_p5 = por %p281_p4, %p280_p3 }
  0x2c   :  { %v65_v24 = vld [vmem:[#allocation5 + $0xc8] sm:$0xff]  ;;  %v39_v25 = vld [vmem:[#allocation2 + $0x8] sm:$0xff]  ;;  %v208_v26 = vpack.c.bf16 %v47_v22, %v46_v21  ;;  %v48_v28 = vld [vmem:[#allocation5 + $0x40] sm:$0xff] }
  0x2d   :  { %136 = vmatprep.mubr.f32.mxu0 %v39_v25  ;;  %v210_v27 = vpack.c.bf16 %v65_v24, %v64_v23  ;;  %v49_v29 = vld [vmem:[#allocation5 + $0x48] sm:$0xff]  ;;  %v66_v30 = vld [vmem:[#allocation5 + $0xd0] sm:$0xff]  ;;  %v67_v31 = vld [vmem:[#allocation5 + $0xd8] sm:$0xff]  ;;  %p283_p6 = pnand %p282_p5, %p276_p2 }
  0x2e   :  { %201 = vmatpush3.bf16.msra.mxu0 %v200_v13  ;;  %v212_v32 = vpack.c.bf16 %v49_v29, %v48_v28  ;;  %v214_v33 = vpack.c.bf16 %v67_v31, %v66_v30  ;;  %v50_v34 = vld [vmem:[#allocation5 + $0x50] sm:$0xff]  ;;  %v51_v35 = vld [vmem:[#allocation5 + $0x58] sm:$0xff]  ;;  %v68_v36 = vld [vmem:[#allocation5 + $0xe0] sm:$0xff] }
  0x2f   :  { %203 = vmatprep.subr.bf16.mxu0 %v202_v14  ;;  %v69_v37 = vld [vmem:[#allocation5 + $0xe8] sm:$0xff]  ;;  %v216_v38 = vpack.c.bf16 %v51_v35, %v50_v34  ;;  %v52_v40 = vld [vmem:[#allocation5 + $0x60] sm:$0xff]  ;;  %v70_v42 = vld [vmem:[#allocation5 + $0xf0] sm:$0xff] }
  0x30   :  { %v218_v39 = vpack.c.bf16 %v69_v37, %v68_v36  ;;  %v53_v41 = vld [vmem:[#allocation5 + $0x68] sm:$0xff]  ;;  %v71_v43 = vld [vmem:[#allocation5 + $0xf8] sm:$0xff]  ;;  %v54_v46 = vld [vmem:[#allocation5 + $0x70] sm:$0xff] }
  0x31   :  { %v220_v44 = vpack.c.bf16 %v53_v41, %v52_v40  ;;  %v222_v45 = vpack.c.bf16 %v71_v43, %v70_v42  ;;  %v55_v47 = vld [vmem:[#allocation5 + $0x78] sm:$0xff]  ;;  %v38_v49 = vld [vmem:[#allocation2] sm:$0xff] }
  0x32   :  { %205 = vmatpush3.bf16.msra.mxu0 %v204_v19  ;;  %v224_v48 = vpack.c.bf16 %v55_v47, %v54_v46 }
  0x33   :  { %207 = vmatprep.subr.bf16.mxu0 %v206_v20 }
  0x36   :  { %209 = vmatpush3.bf16.msra.mxu0 %v208_v26 }
  0x37   :  { %211 = vmatprep.subr.bf16.mxu0 %v210_v27 }
  0x3a   :  { %213 = vmatpush3.bf16.msra.mxu0 %v212_v32 }
  0x3b   :  { %215 = vmatprep.subr.bf16.mxu0 %v214_v33 }
  0x3e   :  { %217 = vmatpush3.bf16.msra.mxu0 %v216_v38 }
  0x3f   :  { %219 = vmatprep.subr.bf16.mxu0 %v218_v39 }
  0x42   :  { %221 = vmatpush3.bf16.msra.mxu0 %v220_v44 }
  0x43   :  { %223 = vmatprep.subr.bf16.mxu0 %v222_v45 }
  0x46   :  { %225 = vmatpush3.bf16.msra.mxu0 %v224_v48 }
  0x49   :  { %137 = vmatmul.mubr.f32.vlgmr.msra.gmra.mrb[0].mxu0 %v38_v49 }
 0x11c   :  { %v191_v50 = vpop.f32.mrb[0].mxu0 }
 0x11d   :  { %v192_v51 = vpop.f32.mrb[1].mxu0 }
 0x11e   :  { %v193_v52 = vadd.f32 %v192_v51, %v191_v50 }
 0x120   :  { %142 = vst [vmem:[#allocation7] sm:$0xff] %v193_v52 }
 0x121   :  { %286 = shalt.err (!%p283_p6)
}
 0x122   :  { %s287_s10 = scalar_lea.hbm %s368_s2, 128 }
 0x123   :  { %p288_p7 = scmp.ne.s32.totalorder %s368_s2, %s287_s10  ;;  %p291_p8 = scmp.lt.u32.totalorder %s287_s10, %s368_s2 }
 0x125   :  { %p293_p9 = pnand %p291_p8, %p288_p7 }
 0x127   :  { %296 = shalt.err (!%p293_p9)
}
 0x128   :  { %152 = dma.vmem_to_hbm [thread:$0]  %s150_s6, 128, %s368_s2, [#allocation4]  }
 0x129   :  { %301 = dma.done.wait [#allocation4], 128  }
 0x12a   :  { %302 = vsyncadd [#allocation4], 4294967168 }
 0x12b   :  { %156 = vsyncpa [#allocation3], 1 }
 0x12c   :  { %157 = vsyncpa [#allocation6], 1 }
 0x12d   :  { %158 = vsyncpa [#allocation4], 1 }

</bundles_post_ra>
